<compile_context>
chip_gen: v7x
topology: tpu7x:2x2x1
jax: 0.10.0
libtpu: 0.0.40
codegen_flags: <defaults>
</compile_context>

<pallas_src>
import jax
import jax.numpy as jnp
from jax.experimental import pallas as pl
from jax.experimental.pallas import tpu as pltpu


def policy_kernel_2act(x_ref, w1_ref, b1_ref, wd_ref, bd_ref, out_ref):
    """Specialized 2-action head.  Batch is on the lane axis.

    x_ref : (S, R)    state features, batch lane-dense
    w1_ref: (H, S)    fc1.weight (PyTorch layout)
    b1_ref: (H, 1)    fc1.bias
    wd_ref: (H, 1)    fc2.weight[1,:] - fc2.weight[0,:]
    bd_ref: (1, 1)    fc2.bias[1] - fc2.bias[0]
    out_ref:(2, R)    softmax probs, batch lane-dense
    """
    x = x_ref[...]
    w1 = w1_ref[...]
    b1 = b1_ref[...]
    wd = wd_ref[...]
    bd = bd_ref[...]

    S, R = x.shape
    H = w1.shape[0]

    # fc1 + ReLU: S unrolled outer-product FMAs on full (lane-dense) vregs.
    h = jnp.broadcast_to(b1, (H, R))
    for k in range(S):
        xk = jnp.broadcast_to(x[k:k + 1, :], (H, R))   # sublane broadcast of batch row k
        h = h + w1[:, k:k + 1] * xk
    h = jnp.maximum(h, 0.0)

    # Folded 2-class head: d = wd . h + bd (logit difference), p1 = sigmoid(d).
    d = jnp.sum(h * wd, axis=0, keepdims=True) + bd          # (1, R)
    p1 = pl.reciprocal(1.0 + jnp.exp(-d), approx=False)       # exact: rows sum to 1
    out_ref[0:1, :] = (1.0 - p1).astype(out_ref.dtype)
    out_ref[1:2, :] = p1.astype(out_ref.dtype)


def policy_kernel_general(x_ref, w1_ref, b1_ref, w2_ref, b2_ref, out_ref):
    """General A-action fallback (same transposed, lane-dense layout)."""
    x = x_ref[...]          # (S, R)
    w1 = w1_ref[...]        # (H, S)
    b1 = b1_ref[...]        # (H, 1)
    w2 = w2_ref[...]        # (A, H)
    b2 = b2_ref[...]        # (A, 1)

    S, R = x.shape
    H = w1.shape[0]
    A = w2.shape[0]

    h = jnp.broadcast_to(b1, (H, R))
    for k in range(S):
        xk = jnp.broadcast_to(x[k:k + 1, :], (H, R))
        h = h + w1[:, k:k + 1] * xk
    h = jnp.maximum(h, 0.0)

    logits = jnp.broadcast_to(b2, (A, R))
    for k in range(H):
        hk = jnp.broadcast_to(h[k:k + 1, :], (A, R))
        logits = logits + w2[:, k:k + 1] * hk

    m = jnp.max(logits, axis=0, keepdims=True)
    e = jnp.exp(logits - m)
    denom = jnp.sum(e, axis=0, keepdims=True)
    out_ref[...] = (e * pl.reciprocal(denom, approx=False)).astype(out_ref.dtype)


def _round_up(a, m):
    return ((a + m - 1) // m) * m


def policy_forward(x, w1, b1, w2, b2, *, block_rows=32768):
    """Forward pass of Policy.

    x : (B, state_size) f32
    w1: (hidden, state)  = fc1.weight   b1: (hidden,) = fc1.bias
    w2: (action, hidden) = fc2.weight   b2: (action,) = fc2.bias
    Returns (B, action_size) softmax probabilities.

    Batch as many env steps / trajectory states as possible into B.  The
    wrapper transposes to a (feature, batch) lane-dense layout, pads batch to
    a 128-aligned block size, and tiles it over a 1-D "parallel" grid.
    """
    B, S = x.shape
    H = w1.shape[0]
    A = w2.shape[0]

    # Lane-aligned row blocks, adaptive to B, capped at block_rows.
    b128 = _round_up(B, 128)
    rows = min(_round_up(block_rows, 128), b128)
    # Keep the parallel grid >= 2 steps when there is enough work so v7x's
    # two TensorCores can split it (harmless on single-TC v5e/v6e).
    if rows == b128 and b128 >= 256:
        rows = _round_up((b128 + 1) // 2, 128)
    padded = _round_up(b128, rows)
    grid = (padded // rows,)

    # Transposed, lane-dense input slab (layout plumbing stays in the wrapper).
    x_t = jnp.pad(x.astype(jnp.float32).T, ((0, 0), (0, padded - B)))

    w1f = w1.astype(jnp.float32)
    b1c = b1.astype(jnp.float32).reshape(H, 1)

    if A == 2:
        # Fold the 2-class head into a single weight/bias difference.
        wd = (w2[1, :] - w2[0, :]).astype(jnp.float32).reshape(H, 1)
        bd = (b2[1] - b2[0]).astype(jnp.float32).reshape(1, 1)
        kernel = policy_kernel_2act
        extra_inputs = (wd, bd)
        extra_specs = [
            pl.BlockSpec((H, 1), lambda i: (0, 0)),
            pl.BlockSpec((1, 1), lambda i: (0, 0)),
        ]
        flops = 2 * padded * (S * H + H)
        transcendentals = padded
    else:
        w2f = w2.astype(jnp.float32)
        b2c = b2.astype(jnp.float32).reshape(A, 1)
        kernel = policy_kernel_general
        extra_inputs = (w2f, b2c)
        extra_specs = [
            pl.BlockSpec((A, H), lambda i: (0, 0)),
            pl.BlockSpec((A, 1), lambda i: (0, 0)),
        ]
        flops = 2 * padded * (S * H + H * A)
        transcendentals = padded * A

    bytes_accessed = 4 * (padded * S + padded * A + H * S + H + H * A + A)

    out_t = pl.pallas_call(
        kernel,
        out_shape=jax.ShapeDtypeStruct((A, padded), jnp.float32),
        grid_spec=pltpu.PrefetchScalarGridSpec(
            num_scalar_prefetch=0,
            grid=grid,
            in_specs=[
                pl.BlockSpec((S, rows), lambda i: (0, i)),   # x tile (lane-dense batch)
                pl.BlockSpec((H, S), lambda i: (0, 0)),      # fc1.weight (resident)
                pl.BlockSpec((H, 1), lambda i: (0, 0)),      # fc1.bias
                *extra_specs,                                # folded / full fc2 params
            ],
            out_specs=pl.BlockSpec((A, rows), lambda i: (0, i)),
        ),
        compiler_params=pltpu.CompilerParams(
            dimension_semantics=("parallel",),
            vmem_limit_bytes=48 * 1024 * 1024,   # headroom under v7x's 64 MiB VMEM
        ),
        cost_estimate=pl.CostEstimate(
            flops=flops,
            transcendentals=transcendentals,
            bytes_accessed=bytes_accessed,
        ),
    )(x_t, w1f, b1c, *extra_inputs)

    return out_t[:, :B].T


def init_params(key, state_size=4, hidden_size=16, action_size=2):
    """PyTorch nn.Linear-style init (uniform +-1/sqrt(fan_in)), PyTorch layout:
    w1 (hidden, state), b1 (hidden,), w2 (action, hidden), b2 (action,)."""
    k1, k2, k3, k4 = jax.random.split(key, 4)
    bound1 = 1.0 / jnp.sqrt(jnp.float32(state_size))
    bound2 = 1.0 / jnp.sqrt(jnp.float32(hidden_size))
    w1 = jax.random.uniform(k1, (hidden_size, state_size), jnp.float32, -bound1, bound1)
    b1 = jax.random.uniform(k2, (hidden_size,), jnp.float32, -bound1, bound1)
    w2 = jax.random.uniform(k3, (action_size, hidden_size), jnp.float32, -bound2, bound2)
    b2 = jax.random.uniform(k4, (action_size,), jnp.float32, -bound2, bound2)
    return w1, b1, w2, b2


def _reference(x, w1, b1, w2, b2):
    hp = jax.lax.Precision.HIGHEST
    h = jnp.maximum(jnp.dot(x, w1.T, precision=hp) + b1, 0.0)
    return jax.nn.softmax(jnp.dot(h, w2.T, precision=hp) + b2, axis=1)


if __name__ == "__main__":
    key = jax.random.PRNGKey(0)
    kx1, kx2, kx3, kp = jax.random.split(key, 4)

    state_size, hidden_size, action_size = 4, 16, 2
    w1, b1, w2, b2 = init_params(kp, state_size, hidden_size, action_size)

    # act()-style single state (batch of 1).
    x1 = jax.random.normal(kx1, (1, state_size), jnp.float32)
    p1 = jax.block_until_ready(policy_forward(x1, w1, b1, w2, b2))
    r1 = _reference(x1, w1, b1, w2, b2)
    assert p1.shape == (1, action_size)
    assert jnp.allclose(p1, r1, atol=1e-4, rtol=1e-4)
    assert jnp.allclose(jnp.sum(p1, axis=1), 1.0, atol=1e-6)

    # Small batch (exercises 128-lane padding of the batch axis).
    x2 = jax.random.normal(kx2, (50, state_size), jnp.float32)
    p2 = jax.block_until_ready(policy_forward(x2, w1, b1, w2, b2))
    r2 = _reference(x2, w1, b1, w2, b2)
    assert p2.shape == (50, action_size)
    assert jnp.allclose(p2, r2, atol=1e-4, rtol=1e-4)
    assert jnp.allclose(jnp.sum(p2, axis=1), 1.0, atol=1e-6)

    # Larger batch (many env steps per call) exercising a multi-step parallel grid.
    x3 = jax.random.normal(kx3, (1029, state_size), jnp.float32)
    p3 = jax.block_until_ready(policy_forward(x3, w1, b1, w2, b2))
    r3 = _reference(x3, w1, b1, w2, b2)
    assert p3.shape == (1029, action_size)
    assert jnp.allclose(p3, r3, atol=1e-4, rtol=1e-4)
    assert jnp.allclose(jnp.sum(p3, axis=1), 1.0, atol=1e-6)

    # TODO(synk): Categorical sampling in act() and the Adam optimizer are
    # host/training-side and intentionally not part of the forward kernel.
    print("KERNEL_OK")
</pallas_src>

<mosaic_0001>
module attributes {stable_mosaic.version = 11 : i64} {
  func.func @policy_kernel_2act(%arg0: i32, %arg1: memref<4x128xf32, #tpu.memory_space<vmem>>, %arg2: memref<16x4xf32, #tpu.memory_space<vmem>>, %arg3: memref<16x1xf32, #tpu.memory_space<vmem>>, %arg4: memref<16x1xf32, #tpu.memory_space<vmem>>, %arg5: memref<1x1xf32, #tpu.memory_space<vmem>>, %arg6: memref<2x128xf32, #tpu.memory_space<vmem>>) attributes {dimension_semantics = [#tpu.dimension_semantics<parallel>], iteration_bounds = array<i64: 1>, scalar_prefetch = 0 : i64, scratch_operands = 0 : i64, tpu.core_type = #tpu.core_type<tc>, window_params = [{transform_indices = @transform_0, window_bounds = array<i64: 4, 128>}, {pipeline_mode = #tpu.pipeline_mode<synchronous>, transform_indices = @transform_1, window_bounds = array<i64: 16, 4>}, {pipeline_mode = #tpu.pipeline_mode<synchronous>, transform_indices = @transform_2, window_bounds = array<i64: 16, 1>}, {pipeline_mode = #tpu.pipeline_mode<synchronous>, transform_indices = @transform_3, window_bounds = array<i64: 16, 1>}, {pipeline_mode = #tpu.pipeline_mode<synchronous>, transform_indices = @transform_4, window_bounds = array<i64: 1, 1>}, {transform_indices = @transform_5, window_bounds = array<i64: 2, 128>}]} {
    %c0 = arith.constant 0 : index
    %c0_0 = arith.constant 0 : index
    %0 = vector.load %arg1[%c0, %c0_0] : memref<4x128xf32, #tpu.memory_space<vmem>>, vector<4x128xf32>
    %c0_1 = arith.constant 0 : index
    %c0_2 = arith.constant 0 : index
    %1 = vector.load %arg2[%c0_1, %c0_2] : memref<16x4xf32, #tpu.memory_space<vmem>>, vector<16x4xf32>
    %c0_3 = arith.constant 0 : index
    %c0_4 = arith.constant 0 : index
    %2 = vector.load %arg3[%c0_3, %c0_4] : memref<16x1xf32, #tpu.memory_space<vmem>>, vector<16x1xf32>
    %c0_5 = arith.constant 0 : index
    %c0_6 = arith.constant 0 : index
    %3 = vector.load %arg4[%c0_5, %c0_6] : memref<16x1xf32, #tpu.memory_space<vmem>>, vector<16x1xf32>
    %c0_7 = arith.constant 0 : index
    %c0_8 = arith.constant 0 : index
    %4 = vector.load %arg5[%c0_7, %c0_8] : memref<1x1xf32, #tpu.memory_space<vmem>>, vector<1x1xf32>
    %5 = vector.shape_cast %2 : vector<16x1xf32> to vector<16x1xf32>
    %6 = vector.broadcast %5 : vector<16x1xf32> to vector<16x128xf32>
    %7 = vector.extract_strided_slice %0 {offsets = [0, 0], sizes = [1, 128], strides = [1, 1]} : vector<4x128xf32> to vector<1x128xf32>
    %8 = vector.shape_cast %7 : vector<1x128xf32> to vector<1x128xf32>
    %9 = vector.broadcast %8 : vector<1x128xf32> to vector<16x128xf32>
    %10 = vector.extract_strided_slice %1 {offsets = [0, 0], sizes = [16, 1], strides = [1, 1]} : vector<16x4xf32> to vector<16x1xf32>
    %11 = vector.broadcast %10 : vector<16x1xf32> to vector<16x128xf32>
    %12 = arith.mulf %11, %9 : vector<16x128xf32>
    %13 = arith.addf %6, %12 : vector<16x128xf32>
    %14 = vector.extract_strided_slice %0 {offsets = [1, 0], sizes = [1, 128], strides = [1, 1]} : vector<4x128xf32> to vector<1x128xf32>
    %15 = vector.shape_cast %14 : vector<1x128xf32> to vector<1x128xf32>
    %16 = vector.broadcast %15 : vector<1x128xf32> to vector<16x128xf32>
    %17 = vector.extract_strided_slice %1 {offsets = [0, 1], sizes = [16, 1], strides = [1, 1]} : vector<16x4xf32> to vector<16x1xf32>
    %18 = vector.broadcast %17 : vector<16x1xf32> to vector<16x128xf32>
    %19 = arith.mulf %18, %16 : vector<16x128xf32>
    %20 = arith.addf %13, %19 : vector<16x128xf32>
    %21 = vector.extract_strided_slice %0 {offsets = [2, 0], sizes = [1, 128], strides = [1, 1]} : vector<4x128xf32> to vector<1x128xf32>
    %22 = vector.shape_cast %21 : vector<1x128xf32> to vector<1x128xf32>
    %23 = vector.broadcast %22 : vector<1x128xf32> to vector<16x128xf32>
    %24 = vector.extract_strided_slice %1 {offsets = [0, 2], sizes = [16, 1], strides = [1, 1]} : vector<16x4xf32> to vector<16x1xf32>
    %25 = vector.broadcast %24 : vector<16x1xf32> to vector<16x128xf32>
    %26 = arith.mulf %25, %23 : vector<16x128xf32>
    %27 = arith.addf %20, %26 : vector<16x128xf32>
    %28 = vector.extract_strided_slice %0 {offsets = [3, 0], sizes = [1, 128], strides = [1, 1]} : vector<4x128xf32> to vector<1x128xf32>
    %29 = vector.shape_cast %28 : vector<1x128xf32> to vector<1x128xf32>
    %30 = vector.broadcast %29 : vector<1x128xf32> to vector<16x128xf32>
    %31 = vector.extract_strided_slice %1 {offsets = [0, 3], sizes = [16, 1], strides = [1, 1]} : vector<16x4xf32> to vector<16x1xf32>
    %32 = vector.broadcast %31 : vector<16x1xf32> to vector<16x128xf32>
    %33 = arith.mulf %32, %30 : vector<16x128xf32>
    %34 = arith.addf %27, %33 : vector<16x128xf32>
    %cst = arith.constant 0.000000e+00 : f32
    %35 = vector.broadcast %cst : f32 to vector<16x128xf32>
    %36 = arith.maximumf %34, %35 : vector<16x128xf32>
    %37 = vector.broadcast %3 : vector<16x1xf32> to vector<16x128xf32>
    %38 = arith.mulf %36, %37 : vector<16x128xf32>
    %cst_9 = arith.constant dense<0.000000e+00> : vector<128xf32>
    %39 = vector.multi_reduction <add>, %38, %cst_9 [0] : vector<16x128xf32> to vector<128xf32>
    %40 = vector.shape_cast %39 : vector<128xf32> to vector<1x128xf32>
    %41 = vector.broadcast %4 : vector<1x1xf32> to vector<1x128xf32>
    %42 = arith.addf %40, %41 : vector<1x128xf32>
    %cst_10 = arith.constant 0.000000e+00 : f32
    %43 = vector.broadcast %cst_10 : f32 to vector<1x128xf32>
    %44 = arith.subf %43, %42 : vector<1x128xf32>
    %45 = math.exp %44 : vector<1x128xf32>
    %cst_11 = arith.constant 1.000000e+00 : f32
    %46 = vector.broadcast %cst_11 : f32 to vector<1x128xf32>
    %47 = arith.addf %46, %45 : vector<1x128xf32>
    %48 = tpu.reciprocal %47 : vector<1x128xf32> -> vector<1x128xf32>
    %cst_12 = arith.constant 1.000000e+00 : f32
    %49 = vector.broadcast %cst_12 : f32 to vector<1x128xf32>
    %50 = arith.subf %49, %48 : vector<1x128xf32>
    %c0_13 = arith.constant 0 : index
    %c0_14 = arith.constant 0 : index
    %51 = vector.load %arg6[%c0_13, %c0_14] : memref<2x128xf32, #tpu.memory_space<vmem>>, vector<1x128xf32>
    tpu.vector_store %arg6[%c0_13, %c0_14], %50 {strides = array<i32>} : memref<2x128xf32, #tpu.memory_space<vmem>>, vector<1x128xf32>,
    %c1 = arith.constant 1 : index
    %c0_15 = arith.constant 0 : index
    %52 = vector.load %arg6[%c1, %c0_15] : memref<2x128xf32, #tpu.memory_space<vmem>>, vector<1x128xf32>
    tpu.vector_store %arg6[%c1, %c0_15], %48 {strides = array<i32>} : memref<2x128xf32, #tpu.memory_space<vmem>>, vector<1x128xf32>,
    return
  }
  func.func @transform_0(%arg0: i32) -> (i32, i32) {
    %c0_i32 = arith.constant 0 : i32
    %c0_i32_0 = arith.constant 0 : i32
    return %c0_i32, %arg0 : i32, i32
  }
  func.func @transform_1(%arg0: i32) -> (i32, i32) {
    %c0_i32 = arith.constant 0 : i32
    %c0_i32_0 = arith.constant 0 : i32
    %c0_i32_1 = arith.constant 0 : i32
    return %c0_i32, %c0_i32_0 : i32, i32
  }
  func.func @transform_2(%arg0: i32) -> (i32, i32) {
    %c0_i32 = arith.constant 0 : i32
    %c0_i32_0 = arith.constant 0 : i32
    %c0_i32_1 = arith.constant 0 : i32
    return %c0_i32, %c0_i32_0 : i32, i32
  }
  func.func @transform_3(%arg0: i32) -> (i32, i32) {
    %c0_i32 = arith.constant 0 : i32
    %c0_i32_0 = arith.constant 0 : i32
    %c0_i32_1 = arith.constant 0 : i32
    return %c0_i32, %c0_i32_0 : i32, i32
  }
  func.func @transform_4(%arg0: i32) -> (i32, i32) {
    %c0_i32 = arith.constant 0 : i32
    %c0_i32_0 = arith.constant 0 : i32
    %c0_i32_1 = arith.constant 0 : i32
    return %c0_i32, %c0_i32_0 : i32, i32
  }
  func.func @transform_5(%arg0: i32) -> (i32, i32) {
    %c0_i32 = arith.constant 0 : i32
    %c0_i32_0 = arith.constant 0 : i32
    return %c0_i32, %arg0 : i32, i32
  }
}

</mosaic_0001>

<bundles_post_ra>
// kernel: tpu_custom_call.1
= control target key start
LH: loop header
LB: loop body
LE: loop exit
PB: predicated region body
PF: predicated region fallthrough
CT: control target
= control target key end

     0   :  { %s273_s0 = inlined_call_operand.vmem [shape: f32[4,128], index: 0, kind: input, shape index: {}]   ;;  %s274_s1 = inlined_call_operand.vmem [shape: f32[16,4], index: 1, kind: input, shape index: {}]   ;;  %s275_s2 = inlined_call_operand.vmem [shape: f32[16,1], index: 2, kind: input, shape index: {}]   ;;  %s276_s3 = inlined_call_operand.vmem [shape: f32[16,1], index: 3, kind: input, shape index: {}]   ;;  %s277_s4 = inlined_call_operand.<no memory space> [shape: f32[1,1], index: 4, kind: input, shape index: {}]   ;;  %s278_s5 = inlined_call_operand.hbm [shape: f32[2,128], index: 5, kind: output, shape index: {}]  }
   0x1   :  { %v10_v0 = vstv %s277_s4 }
   0x2   :  { %11 = vst [vmem:[#allocation2] sm:$0x1] %v10_v0 }
   0x3   :  { %v26_v1 = vld [vmem:[%s275_s2] sm:$0xff]  ;;  %v202_v3 = vmov 0   ;;  %v27_v4 = vld [vmem:[%s275_s2 + $0x8] sm:$0xff] }
   0x4   :  { %v24_v2 = vld [vmem:[%s274_s1] sm:$0xff]  ;;  %166 = vset.pattern.permute.xlu1 %v202_v3  ;;  %165 = vset.pattern.permute.xlu0 %v202_v3  ;;  %v25_v5 = vld [vmem:[%s274_s1 + $0x8] sm:$0xff] }
   0x5   :  { %33 = vperm.xlu1 %166, %v26_v1   ;;  %47 = vperm.xlu0 %165, %v24_v2  }
   0x6   :  { %12 = vsyncpa [#allocation4], 0  ;;  %v203_v6 = vmov 1   ;;  %v204_v7 = vmov 2   ;;  %v28_v8 = vld [vmem:[%s276_s3] sm:$0xff]  ;;  %v205_v9 = vmov 3   ;;  %v41_v12 = vlaneseq }
   0x7   :  { %v29_v10 = vld [vmem:[%s276_s3 + $0x8] sm:$0xff]  ;;  %v23_v18 = vld [vmem:[%s273_s0] sm:$0xf]  ;;  %s206_s0 = smov [#allocation3]  }
   0x8   :  { %v42_v14 = vshrl.u32 %v41_v12, 7  ;;  %s152_s3 = sshll.u32 %s206_s0, 4  ;;  %s153_s3 = int_to_ptr.vmem [resolvable:$true] %s152_s3 }
   0x9   :  { %38 = vperm.xlu1 %166, %v27_v4   ;;  %52 = vperm.xlu0 %165, %v25_v5   ;;  %v30_v11 = vld [vmem:[#allocation2] sm:$0x1]  ;;  %s178_s6 = scalar_lea.vmem %s153_s3, 32  ;;  %p183_p1 = scmp.lt.s32.totalorder %s153_s3, %s153_s3 }
   0xa   :  { %v43_v16 = vsub.s32 0, %v42_v14  ;;  %v61_v20 = vsub.s32 1, %v42_v14  ;;  %v77_v22 = vsub.s32 2, %v42_v14  ;;  %v93_v28 = vsub.s32 3, %v42_v14  ;;  %p179_p0 = scmp.ne.s32.totalorder %s153_s3, %s178_s6  ;;  %p184_p2 = scmp.lt.s32.totalorder %s178_s6, %s178_s6 }
   0xc   :  { %v44_v21 = vrot.slane %v23_v18, %v43_v16  ;;  %v62_v24 = vrot.slane %v23_v18, %v61_v20  ;;  %v78_v27 = vrot.slane %v23_v18, %v77_v22  ;;  %v94_v34 = vrot.slane %v23_v18, %v93_v28  ;;  %p185_p3 = por %p184_p2, %p183_p1 }
   0xd   :  { %168 = vset.pattern.permute.xlu1 %v203_v6  ;;  %167 = vset.pattern.permute.xlu0 %v203_v6 }
   0xe   :  { %68 = vperm.xlu1 %168, %v25_v5   ;;  %64 = vperm.xlu0 %167, %v24_v2   ;;  %p186_p4 = pnand %p185_p3, %p179_p0 }
  0x12   :  { %169 = vset.pattern.permute.xlu1 %v204_v7  ;;  %170 = vset.pattern.permute.xlu0 %v204_v7 }
  0x13   :  { %80 = vperm.xlu1 %169, %v24_v2   ;;  %84 = vperm.xlu0 %170, %v25_v5  }
  0x17   :  { %171 = vset.pattern.permute.xlu1 %v205_v9  ;;  %172 = vset.pattern.permute.xlu0 %v202_v3 }
  0x18   :  { %96 = vperm.xlu1 %171, %v24_v2   ;;  %111 = vperm.xlu0 %172, %v28_v8  }
  0x1c   :  { %100 = vperm.xlu1 %171, %v25_v5  }
  0x20   :  { %173 = vset.pattern.permute.xlu1 %v202_v3 }
  0x21   :  { %116 = vperm.xlu1 %173, %v29_v10  }
  0x25   :  { %130 = vperm.xlu1 %173, %v30_v11  }
  0x84   :  { %v34_v13 = vpop.permute.xlu1 %33  ;;  %v48_v15 = vpop.permute.xlu0 %47 }
  0x85   :  { %v55_v26 = vmul.f32 %v48_v15, %v44_v21 }
  0x87   :  { %v57_v31 = vadd.f32 %v55_v26, %v34_v13 }
  0x88   :  { %v39_v17 = vpop.permute.xlu1 %38  ;;  %v53_v19 = vpop.permute.xlu0 %52 }
  0x89   :  { %v56_v32 = vmul.f32 %v53_v19, %v44_v21 }
  0x8b   :  { %v58_v39 = vadd.f32 %v56_v32, %v39_v17 }
  0x8d   :  { %v69_v23 = vpop.permute.xlu1 %68  ;;  %v65_v25 = vpop.permute.xlu0 %64 }
  0x8e   :  { %v71_v29 = vmul.f32 %v65_v25, %v62_v24  ;;  %v72_v36 = vmul.f32 %v69_v23, %v62_v24 }
  0x90   :  { %v73_v37 = vadd.f32 %v71_v29, %v57_v31  ;;  %v74_v43 = vadd.f32 %v72_v36, %v58_v39 }
  0x92   :  { %v81_v30 = vpop.permute.xlu1 %80  ;;  %v85_v35 = vpop.permute.xlu0 %84 }
  0x93   :  { %v87_v33 = vmul.f32 %v81_v30, %v78_v27  ;;  %v88_v41 = vmul.f32 %v85_v35, %v78_v27 }
  0x95   :  { %v89_v40 = vadd.f32 %v87_v33, %v73_v37  ;;  %v90_v46 = vadd.f32 %v88_v41, %v74_v43 }
  0x97   :  { %v97_v38 = vpop.permute.xlu1 %96  ;;  %v112_v50 = vpop.permute.xlu0 %111 }
  0x98   :  { %v103_v42 = vmul.f32 %v97_v38, %v94_v34 }
  0x9a   :  { %v105_v44 = vadd.f32 %v103_v42, %v89_v40 }
  0x9b   :  { %v101_v45 = vpop.permute.xlu1 %100 }
  0x9c   :  { %v104_v47 = vmul.f32 %v101_v45, %v94_v34  ;;  %v107_v49 = vmax.f32 %v105_v44, 0.0 }
  0x9e   :  { %v106_v48 = vadd.f32 %v104_v47, %v90_v46  ;;  %v119_v53 = vmul.f32 %v112_v50, %v107_v49 }
  0xa0   :  { %v117_v51 = vpop.permute.xlu1 %116  ;;  %v108_v52 = vmax.f32 %v106_v48, 0.0 }
  0xa2   :  { %v120_v54 = vmul.f32 %v117_v51, %v108_v52 }
  0xa4   :  { %v121_v55 = vadd.f32 %v120_v54, %v119_v53  ;;  %v131_v60 = vpop.permute.xlu1 %130 }
  0xa5   :  { %v136_v63 = vrot.slane %v131_v60, %v43_v16 }
  0xa6   :  { %v122_v56 = vrot.slane %v121_v55, 4 }
  0xa8   :  { %v123_v57 = vadd.f32 %v122_v56, %v121_v55 }
  0xaa   :  { %v124_v58 = vrot.slane %v123_v57, 2 }
  0xac   :  { %v125_v59 = vadd.f32 %v124_v58, %v123_v57 }
  0xae   :  { %v126_v61 = vrot.slane %v125_v59, 1 }
  0xb0   :  { %v127_v62 = vadd.f32 %v126_v61, %v125_v59 }
  0xb2   :  { %v137_v0 = vadd.f32 %v136_v63, %v127_v62 }
  0xb4   :  { %v138_v1 = vsub.f32 0.0, %v137_v0 }
  0xb6   :  { %v139_v2 = vmul.f32 1.442695, %v138_v1 }
  0xb8   :  { %174 = vpow2.f32 %v139_v2 }
  0xc2   :  { %v175_v3 = vpop.eup %174 }
  0xc3   :  { %v141_v4 = vadd.f32 1.0, %v175_v3 }
  0xc5   :  { %176 = vrcp.f32 %v141_v4 }
  0xcf   :  { %v177_v5 = vpop.eup %176 }
  0xd0   :  { %145 = vst [vmem:[#allocation3 + $0x1] sm:$0x1] %v177_v5  ;;  %v143_v6 = vsub.f32 1.0, %v177_v5 }
  0xd2   :  { %144 = vst [vmem:[#allocation3] sm:$0x1] %v143_v6 }
  0xd3   :  { %189 = shalt.err (!%p186_p4)
}
  0xd4   :  { %s190_s9 = scalar_lea.hbm %s278_s5, 32 }
  0xd5   :  { %p191_p5 = scmp.ne.s32.totalorder %s278_s5, %s190_s9  ;;  %p194_p6 = scmp.lt.u32.totalorder %s190_s9, %s278_s5 }
  0xd7   :  { %p196_p7 = pnand %p194_p6, %p191_p5 }
  0xd9   :  { %199 = shalt.err (!%p196_p7)
}
  0xda   :  { %155 = dma.vmem_to_hbm [thread:$0]  %s153_s3, 32, %s278_s5, [#allocation4]  }
  0xdb   :  { %200 = dma.done.wait [#allocation4], 32  }
  0xdc   :  { %201 = vsyncadd [#allocation4], 4294967264 }
  0xdd   :  { %159 = vsyncpa [#allocation4], 1 }

</bundles_post_ra>
